<compile_context>
chip_gen: v6e
topology: v6e:2x2x1
jax: 0.10.0
libtpu: 0.0.40
codegen_flags: <defaults>
</compile_context>

<pallas_src>
import functools
import math

import jax
import jax.numpy as jnp
from jax import lax
from jax.experimental import pallas as pl
from jax.experimental.pallas import tpu as pltpu


def _round_up(n, m):
    return ((n + m - 1) // m) * m


def _rmsnorm_kernel(x_ref, w_ref, o_ref, *, eps):
    # x_ref: (block_rows, d_model), w_ref: (1, d_model), o_ref: (block_rows, d_model)
    x = x_ref[...].astype(jnp.float32)
    ms = jnp.mean(x * x, axis=-1, keepdims=True)   # per-row mean of squares (XLU)
    inv = lax.rsqrt(ms + eps)                       # EUP rsqrt
    w = w_ref[...].astype(jnp.float32)              # (1, d_model) broadcast over rows
    o_ref[...] = (x * inv * w).astype(o_ref.dtype)


def _pick_block_rows(n_rows, d_model, itemsize, requested=None):
    """Pick rows-per-block: multiple of 8, large, but VMEM-safe.

    VMEM per grid step ~= 2 (in/out) * 2 (double buffer) * br * d_model * itemsize.
    Target <= ~16 MiB total -> br * d_model * itemsize <= 4 MiB.
    """
    if requested is not None:
        br = requested
    else:
        budget_bytes = 4 * 1024 * 1024
        br = budget_bytes // max(1, d_model * itemsize)
        br = max(8, min(br, 1024))          # keep grid-step overhead negligible
    br = _round_up(br, 8)
    # Never make the block taller than the (sublane-padded) problem.
    br = min(br, _round_up(max(n_rows, 1), 8))
    return br


def rmsnorm(x, weight, eps=1e-5, block_rows=None):
    """Pallas RMSNorm over the last axis of x. weight has shape (d_model,)."""
    orig_shape = x.shape
    d_model = orig_shape[-1]
    n_rows = int(math.prod(orig_shape[:-1])) if len(orig_shape) > 1 else 1

    x2 = x.reshape(n_rows, d_model)
    w2 = weight.reshape(1, d_model)

    br = _pick_block_rows(n_rows, d_model, x.dtype.itemsize, block_rows)
    grid = (pl.cdiv(n_rows, br),)

    out = pl.pallas_call(
        functools.partial(_rmsnorm_kernel, eps=eps),
        out_shape=jax.ShapeDtypeStruct((n_rows, d_model), x.dtype),
        grid=grid,
        in_specs=[
            pl.BlockSpec((br, d_model), lambda i: (i, 0)),   # activations, row-tiled
            pl.BlockSpec((1, d_model), lambda i: (0, 0)),    # weight, resident
        ],
        out_specs=pl.BlockSpec((br, d_model), lambda i: (i, 0)),
        compiler_params=pltpu.CompilerParams(
            dimension_semantics=("parallel",),               # rows are independent
        ),
    )(x2, w2)

    return out.reshape(orig_shape)


def rmsnorm_ref(x, weight, eps=1e-5):
    """Pure-JAX reference mirroring the PyTorch forward."""
    x32 = x.astype(jnp.float32)
    out = x32 * lax.rsqrt(jnp.mean(x32 * x32, axis=-1, keepdims=True) + eps)
    out = out * weight.astype(jnp.float32)
    return out.astype(x.dtype)


if __name__ == "__main__":
    key = jax.random.PRNGKey(0)
    k1, k2, k3 = jax.random.split(key, 3)

    # Toy config consistent with simple_mamba.py (d_model=32): lane-sparse but correct.
    B, L, D = 2, 8, 32
    x_small = jax.random.normal(k1, (B, L, D), jnp.float32)
    w_small = 1.0 + 0.1 * jax.random.normal(k2, (D,), jnp.float32)

    out_s = jax.block_until_ready(rmsnorm(x_small, w_small))
    ref_s = rmsnorm_ref(x_small, w_small)
    assert out_s.shape == (B, L, D)
    assert jnp.allclose(out_s, ref_s, atol=1e-4, rtol=1e-4), (
        f"small: max abs diff {float(jnp.max(jnp.abs(out_s - ref_s)))}")

    # Larger lane-dense shape (d_model multiple of 128) to exercise the row-tiled
    # grid / pipelining path with several grid steps and a ragged last block.
    B2, L2, D2 = 3, 300, 512
    x_big = jax.random.normal(k3, (B2, L2, D2), jnp.float32)
    w_big = 1.0 + 0.05 * jax.random.normal(k2, (D2,), jnp.float32)

    out_b = jax.block_until_ready(rmsnorm(x_big, w_big))
    ref_b = rmsnorm_ref(x_big, w_big)
    assert out_b.shape == (B2, L2, D2)
    assert jnp.allclose(out_b, ref_b, atol=1e-4, rtol=1e-4), (
        f"big: max abs diff {float(jnp.max(jnp.abs(out_b - ref_b)))}")

    print("KERNEL_OK")
</pallas_src>

<mosaic_0001>
module attributes {stable_mosaic.version = 11 : i64} {
  func.func @_rmsnorm_kernel(%arg0: i32, %arg1: memref<16x32xf32, #tpu.memory_space<vmem>>, %arg2: memref<1x32xf32, #tpu.memory_space<vmem>>, %arg3: memref<16x32xf32, #tpu.memory_space<vmem>>) attributes {dimension_semantics = [#tpu.dimension_semantics<parallel>], iteration_bounds = array<i64: 1>, scalar_prefetch = 0 : i64, scratch_operands = 0 : i64, tpu.core_type = #tpu.core_type<tc>, window_params = [{transform_indices = @transform_0, window_bounds = array<i64: 16, 32>}, {pipeline_mode = #tpu.pipeline_mode<synchronous>, transform_indices = @transform_1, window_bounds = array<i64: 1, 32>}, {transform_indices = @transform_2, window_bounds = array<i64: 16, 32>}]} {
    %c0 = arith.constant 0 : index
    %c0_0 = arith.constant 0 : index
    %0 = vector.load %arg1[%c0, %c0_0] : memref<16x32xf32, #tpu.memory_space<vmem>>, vector<16x32xf32>
    %1 = arith.mulf %0, %0 : vector<16x32xf32>
    %cst = arith.constant dense<0.000000e+00> : vector<16xf32>
    %2 = vector.multi_reduction <add>, %1, %cst [1] : vector<16x32xf32> to vector<16xf32>
    %3 = vector.shape_cast %2 : vector<16xf32> to vector<16x1xf32>
    %cst_1 = arith.constant 3.200000e+01 : f32
    %4 = vector.broadcast %cst_1 : f32 to vector<16x1xf32>
    %5 = arith.divf %3, %4 : vector<16x1xf32>
    %cst_2 = arith.constant 9.99999974E-6 : f32
    %6 = vector.broadcast %cst_2 : f32 to vector<16x1xf32>
    %7 = arith.addf %5, %6 : vector<16x1xf32>
    %8 = math.rsqrt %7 : vector<16x1xf32>
    %c0_3 = arith.constant 0 : index
    %c0_4 = arith.constant 0 : index
    %9 = vector.load %arg2[%c0_3, %c0_4] : memref<1x32xf32, #tpu.memory_space<vmem>>, vector<1x32xf32>
    %10 = vector.broadcast %8 : vector<16x1xf32> to vector<16x32xf32>
    %11 = arith.mulf %0, %10 : vector<16x32xf32>
    %12 = vector.broadcast %9 : vector<1x32xf32> to vector<16x32xf32>
    %13 = arith.mulf %11, %12 : vector<16x32xf32>
    %c0_5 = arith.constant 0 : index
    %c0_6 = arith.constant 0 : index
    %14 = vector.load %arg3[%c0_5, %c0_6] : memref<16x32xf32, #tpu.memory_space<vmem>>, vector<16x32xf32>
    tpu.vector_store %arg3[%c0_5, %c0_6], %13 {strides = array<i32>} : memref<16x32xf32, #tpu.memory_space<vmem>>, vector<16x32xf32>,
    return
  }
  func.func @transform_0(%arg0: i32) -> (i32, i32) {
    %c0_i32 = arith.constant 0 : i32
    %c0_i32_0 = arith.constant 0 : i32
    return %arg0, %c0_i32 : i32, i32
  }
  func.func @transform_1(%arg0: i32) -> (i32, i32) {
    %c0_i32 = arith.constant 0 : i32
    %c0_i32_0 = arith.constant 0 : i32
    %c0_i32_1 = arith.constant 0 : i32
    return %c0_i32, %c0_i32_0 : i32, i32
  }
  func.func @transform_2(%arg0: i32) -> (i32, i32) {
    %c0_i32 = arith.constant 0 : i32
    %c0_i32_0 = arith.constant 0 : i32
    return %arg0, %c0_i32 : i32, i32
  }
}

</mosaic_0001>

<bundles_post_ra>
// kernel: tpu_custom_call.1
= control target key start
LH: loop header
LB: loop body
LE: loop exit
PB: predicated region body
PF: predicated region fallthrough
CT: control target
= control target key end

     0   :  { %7 = vsyncpa [#allocation3], 0  ;;  %s165_s0 = inlined_call_operand.hbm [shape: f32[16,32], index: 0, kind: input, shape index: {}]   ;;  %s166_s1 = inlined_call_operand.vmem [shape: f32[1,32], index: 1, kind: input, shape index: {}]   ;;  %s167_s2 = inlined_call_operand.hbm [shape: f32[16,32], index: 2, kind: output, shape index: {}]  }
   0x1   :  { %8 = vsyncpa [#allocation4], 0  ;;  %s127_s9 = smov [#allocation2]  }
   0x2   :  { %s14_s10 = sshll.u32 %s127_s9, 4  ;;  %s15_s10 = int_to_ptr.vmem [resolvable:$true] %s14_s10 }
   0x3   :  { %s91_s11 = scalar_lea.vmem %s15_s10, 256  ;;  %p96_p1 = scmp.lt.s32.totalorder %s15_s10, %s15_s10 }
   0x4   :  { %p92_p0 = scmp.ne.s32.totalorder %s15_s10, %s91_s11  ;;  %p97_p2 = scmp.lt.s32.totalorder %s91_s11, %s91_s11 }
   0x6   :  { %p98_p3 = por %p97_p2, %p96_p1 }
   0x8   :  { %p99_p4 = pnand %p98_p3, %p92_p0 }
   0xa   :  { %102 = shalt.err (!%p99_p4)
}
   0xb   :  { %s128_s12 = smov 128   ;;  %s129_s13 = smov 8  }
   0xc   :  { %20 = dma.hbm_to_vmem [thread:$0]  %s165_s0, 256, %s15_s10, [#allocation3], %s128_s12, %s128_s12, %s129_s13  }
   0xd   :  { %123 = dma.done.wait [#allocation3], 256  }
   0xe   :  { %124 = vsyncadd [#allocation3], 4294967040  ;;  %v26_v0 = vld [vmem:[#allocation2] sm:$0xff]  ;;  %vm30_vm0 = vcmask 261120   ;;  %v27_v1 = vld [vmem:[#allocation2 + $0x8] sm:$0xff]  ;;  %s130_s17 = smov [#allocation5]  }
   0xf   :  { %v28_v2 = vmul.f32 %v26_v0, %v26_v0  ;;  %v29_v3 = vmul.f32 %v27_v1, %v27_v1  ;;  %v74_v13 = vld [vmem:[%s166_s1] ss:$0 sm:$0xff]  ;;  %s62_s18 = sshll.u32 %s130_s17, 4  ;;  %s63_s18 = int_to_ptr.vmem [resolvable:$true] %s62_s18 }
  0x10   :  { %s103_s19 = scalar_lea.vmem %s63_s18, 256  ;;  %p108_p6 = scmp.lt.s32.totalorder %s63_s18, %s63_s18 }
  0x11   :  { %v31_v4 = vsel %vm30_vm0, %v28_v2, 0.0  ;;  %v34_v5 = vsel %vm30_vm0, %v29_v3, 0.0  ;;  %p104_p5 = scmp.ne.s32.totalorder %s63_s18, %s103_s19  ;;  %p109_p7 = scmp.lt.s32.totalorder %s103_s19, %s103_s19 }
  0x12   :  { %32 = vadd.xlane.f32.xlu0 %v31_v4 }
  0x13   :  { %p110_p8 = por %p109_p7, %p108_p6 }
  0x15   :  { %p111_p9 = pnand %p110_p8, %p104_p5 }
  0x16   :  { %35 = vadd.xlane.f32.xlu0 %v34_v5 }
  0x9b   :  { %v33_v6 = vpop.xlane.xlu0 %32 }
  0x9c   :  { %v38_v7 = vmul.f32 0.03125, %v33_v6 }
  0x9e   :  { %v40_v8 = vadd.f32 1e-05, %v38_v7 }
  0x9f   :  { %v36_v9 = vpop.xlane.xlu0 %35 }
  0xa0   :  { %79 = vrsqrt.f32 %v40_v8  ;;  %v39_v10 = vmul.f32 0.03125, %v36_v9 }
  0xa2   :  { %v41_v11 = vadd.f32 1e-05, %v39_v10 }
  0xa4   :  { %81 = vrsqrt.f32 %v41_v11 }
  0xad   :  { %v80_v12 = vpop.eup %79 }
  0xae   :  { %v45_v14 = vmul.f32 %v80_v12, %v26_v0 }
  0xb0   :  { %v53_v15 = vmul.f32 %v74_v13, %v45_v14 }
  0xb1   :  { %v82_v16 = vpop.eup %81 }
  0xb2   :  { %v46_v17 = vmul.f32 %v82_v16, %v27_v1  ;;  %55 = vst.msk [vmem:[#allocation5] sm:$0xff] %vm30_vm0, %v53_v15 }
  0xb4   :  { %v54_v18 = vmul.f32 %v74_v13, %v46_v17 }
  0xb6   :  { %56 = vst.msk [vmem:[#allocation5 + $0x8] sm:$0xff] %vm30_vm0, %v54_v18 }
  0xb7   :  { %114 = shalt.err (!%p111_p9)
}
  0xb8   :  { %68 = dma.vmem_to_hbm [thread:$0]  %s63_s18, 256, %s167_s2, [#allocation4], %s128_s12, %s128_s12, %s129_s13  }
  0xb9   :  { %125 = dma.done.wait [#allocation4], 256  }
  0xba   :  { %126 = vsyncadd [#allocation4], 4294967040 }
  0xbb   :  { %72 = vsyncpa [#allocation3], 1 }
  0xbc   :  { %73 = vsyncpa [#allocation4], 1 }

</bundles_post_ra>
